<compile_context>
chip_gen: v5e
topology: v5e:2x2
jax: 0.10.0
libtpu: 0.0.40
codegen_flags: <defaults>
</compile_context>

<pallas_src>
import functools

import jax
import jax.numpy as jnp
from jax.experimental import pallas as pl
from jax.experimental.pallas import tpu as pltpu


_SQRT_2_OVER_PI = 0.7978845608028654


def _gelu_tanh(x):
    # gelu_pytorch_tanh: 0.5 * x * (1 + tanh(sqrt(2/pi) * (x + 0.044715 * x^3)))
    return 0.5 * x * (1.0 + jnp.tanh(_SQRT_2_OVER_PI * (x + 0.044715 * x * x * x)))


def _round_up(x, m):
    return (x + m - 1) // m * m


# ---------------------------------------------------------------------------
# Kernels
# ---------------------------------------------------------------------------
def _mlp_kernel_resident(x_ref, w1_ref, b1_ref, w2_ref, b2_ref, o_ref):
    # Weights/biases have constant block index -> DMA'd once, held in VMEM.
    h = jnp.dot(x_ref[...], w1_ref[...], preferred_element_type=jnp.float32)
    h = _gelu_tanh(h + b1_ref[...])
    out = jnp.dot(h.astype(w2_ref.dtype), w2_ref[...],
                  preferred_element_type=jnp.float32)
    o_ref[...] = (out + b2_ref[...]).astype(o_ref.dtype)


def _mlp_kernel_stream(x_ref, w1_ref, b1_ref, w2_ref, b2_ref, o_ref, acc_ref):
    # Used only when grid[1] >= 2 (weights streamed over the intermediate dim).
    k = pl.program_id(1)
    n_k = pl.num_programs(1)

    h = jnp.dot(x_ref[...], w1_ref[...], preferred_element_type=jnp.float32)
    h = _gelu_tanh(h + b1_ref[...])
    partial = jnp.dot(h.astype(w2_ref.dtype), w2_ref[...],
                      preferred_element_type=jnp.float32)

    @pl.when(k == 0)
    def _init():
        acc_ref[...] = partial                      # first block: write, no RMW

    @pl.when(jnp.logical_and(k > 0, k < n_k - 1))
    def _accum():
        acc_ref[...] += partial

    @pl.when(k == n_k - 1)
    def _finalize():
        # Fold the last partial straight into the output (saves one acc store+load).
        o_ref[...] = (acc_ref[...] + partial + b2_ref[...]).astype(o_ref.dtype)


# ---------------------------------------------------------------------------
# Wrapper
# ---------------------------------------------------------------------------
def _vmem_budget_bytes():
    """~85% of physical VMEM (≈108 MiB on v5e/v6e, ≈48 MiB on v7x)."""
    try:
        cap = int(pltpu.get_tpu_info().vmem_capacity_bytes)
    except Exception:
        cap = 64 << 20  # conservative fallback (works on every TPU generation)
    budget = min(cap - (16 << 20), int(cap * 0.85))
    return max(budget, 32 << 20)


@functools.partial(jax.jit, static_argnames=("tm", "ti", "compute_dtype"))
def siglip_mlp(hidden_states, w1, b1, w2, b2, *, tm=1024, ti=None,
               compute_dtype=jnp.bfloat16):
    """hidden_states: (..., H); w1: (H, I); w2: (I, H). Returns (..., H).

    Matmul operands are cast to `compute_dtype` (bf16 by default -> fast MXU path);
    accumulation, bias adds and GELU stay in f32. `ti=None` auto-picks the largest
    intermediate block that fits VMEM (fully-resident weights when possible).
    """
    orig_shape = hidden_states.shape
    H = int(orig_shape[-1])
    I = int(w1.shape[1])
    M = 1
    for d in orig_shape[:-1]:
        M *= int(d)

    out_dtype = hidden_states.dtype
    cdt = jnp.dtype(compute_dtype)

    x2d = hidden_states.reshape(M, H).astype(cdt)
    w1c = w1.astype(cdt)
    w2c = w2.astype(cdt)
    b1f = b1.astype(jnp.float32).reshape(1, I)
    b2f = b2.astype(jnp.float32).reshape(1, H)

    xb = cdt.itemsize
    wb = cdt.itemsize
    ob = jnp.dtype(out_dtype).itemsize

    budget = _vmem_budget_bytes()

    # ----- row tile: multiple of 256 (full MXU passes), >= 2 tiles when M large ---
    tm_eff = min(int(tm), _round_up(M, 256))
    tm_eff = _round_up(max(tm_eff, 256), 256)
    if M >= 512 and _round_up(M, tm_eff) // tm_eff < 2:
        # Split rows so the "parallel" axis can shard across v7x's two TensorCores.
        tm_eff = max(256, _round_up(pl.cdiv(M, 2), 256))

    i_full = _round_up(I, 128)

    def footprint(tm_, ti_, n_k):
        f = 2 * tm_ * H * xb                      # x tile (double buffered)
        f += 2 * (H * ti_ + ti_ * H) * wb         # w1 + w2 blocks (double buffered)
        f += 2 * (ti_ + H) * 4                    # biases (f32)
        f += 2 * tm_ * H * ob                     # output tile
        if n_k > 1:
            f += tm_ * H * 4                      # f32 accumulator scratch
        f += 10 * tm_ * ti_                       # f32 h + bf16 h + GELU temporaries
        return f

    # ----- intermediate tile: prefer fully-resident weights (grid[1] == 1) --------
    if ti is not None:
        ti_candidates = [min(_round_up(int(ti), 128), i_full)]
    else:
        ti_candidates = [i_full] + [t for t in (4096, 2048, 1024, 512, 256, 128)
                                    if t < i_full]
    tm_candidates = sorted({tm_eff, min(tm_eff, 512), min(tm_eff, 256)}, reverse=True)

    chosen = None
    for tm_c in tm_candidates:
        for ti_c in ti_candidates:
            n_k_c = _round_up(I, ti_c) // ti_c
            if footprint(tm_c, ti_c, n_k_c) <= budget:
                chosen = (tm_c, ti_c)
                break
        if chosen is not None:
            break
    if chosen is None:
        chosen = (tm_candidates[-1], ti_candidates[-1])
    tm_eff, ti_eff = chosen

    m_pad = _round_up(M, tm_eff)
    i_pad = _round_up(I, ti_eff)
    n_k = i_pad // ti_eff
    m_tiles = m_pad // tm_eff

    # ----- exact zero padding for ragged dims -------------------------------------
    if m_pad != M:
        x2d = jnp.pad(x2d, ((0, m_pad - M), (0, 0)))
    if i_pad != I:
        w1c = jnp.pad(w1c, ((0, 0), (0, i_pad - I)))
        b1f = jnp.pad(b1f, ((0, 0), (0, i_pad - I)))
        w2c = jnp.pad(w2c, ((0, i_pad - I), (0, 0)))

    vmem_limit = min(budget, max(32 << 20,
                                 int(footprint(tm_eff, ti_eff, n_k) * 1.4)))

    weight_reads = 1 if n_k == 1 else m_tiles
    cost = pl.CostEstimate(
        flops=4 * m_pad * H * i_pad,                 # fc1 + fc2
        transcendentals=m_pad * i_pad,               # one tanh per (token, I) element
        bytes_accessed=(m_pad * H * (xb + ob)
                        + weight_reads * 2 * H * i_pad * wb
                        + (i_pad + H) * 4),
    )

    if n_k == 1:
        # Weights fully resident in VMEM: single pass, no accumulator.
        out2d = pl.pallas_call(
            _mlp_kernel_resident,
            out_shape=jax.ShapeDtypeStruct((m_pad, H), out_dtype),
            grid_spec=pltpu.PrefetchScalarGridSpec(
                num_scalar_prefetch=0,
                grid=(m_tiles,),
                in_specs=[
                    pl.BlockSpec((tm_eff, H), lambda i: (i, 0)),   # x row tile
                    pl.BlockSpec((H, i_pad), lambda i: (0, 0)),    # w1 (resident)
                    pl.BlockSpec((1, i_pad), lambda i: (0, 0)),    # b1 (resident)
                    pl.BlockSpec((i_pad, H), lambda i: (0, 0)),    # w2 (resident)
                    pl.BlockSpec((1, H), lambda i: (0, 0)),        # b2 (resident)
                ],
                out_specs=pl.BlockSpec((tm_eff, H), lambda i: (i, 0)),
            ),
            compiler_params=pltpu.CompilerParams(
                dimension_semantics=("parallel",),
                vmem_limit_bytes=vmem_limit,
            ),
            cost_estimate=cost,
        )(x2d, w1c, b1f, w2c, b2f)
    else:
        # Weights streamed over the intermediate dim (v7x / very large I).
        out2d = pl.pallas_call(
            _mlp_kernel_stream,
            out_shape=jax.ShapeDtypeStruct((m_pad, H), out_dtype),
            grid_spec=pltpu.PrefetchScalarGridSpec(
                num_scalar_prefetch=0,
                grid=(m_tiles, n_k),
                in_specs=[
                    pl.BlockSpec((tm_eff, H), lambda i, k: (i, 0)),   # x row tile
                    pl.BlockSpec((H, ti_eff), lambda i, k: (0, k)),   # w1 block
                    pl.BlockSpec((1, ti_eff), lambda i, k: (0, k)),   # b1 block
                    pl.BlockSpec((ti_eff, H), lambda i, k: (k, 0)),   # w2 block
                    pl.BlockSpec((1, H), lambda i, k: (0, 0)),        # b2
                ],
                out_specs=pl.BlockSpec((tm_eff, H), lambda i, k: (i, 0)),
                scratch_shapes=[pltpu.VMEM((tm_eff, H), jnp.float32)],
            ),
            compiler_params=pltpu.CompilerParams(
                dimension_semantics=("parallel", "arbitrary"),
                vmem_limit_bytes=vmem_limit,
            ),
            cost_estimate=cost,
        )(x2d, w1c, b1f, w2c, b2f)

    out2d = out2d[:M]
    return out2d.reshape(orig_shape)


def reference_mlp(hidden_states, w1, b1, w2, b2):
    h = hidden_states @ w1 + b1
    h = _gelu_tanh(h)
    return h @ w2 + b2


if __name__ == "__main__":
    # SigLipMLP "config": hidden_size=32, intermediate_size=128, hidden_act=gelu_pytorch_tanh
    batch, seq, hidden_size, intermediate_size = 2, 8, 32, 128

    key = jax.random.PRNGKey(0)
    k_x, k_w1, k_b1, k_w2, k_b2 = jax.random.split(key, 5)

    hidden_states = jax.random.normal(k_x, (batch, seq, hidden_size), jnp.float32)
    # nn.Linear parameters, stored as (in, out).
    w1 = jax.random.normal(k_w1, (hidden_size, intermediate_size), jnp.float32) * 0.02
    b1 = jax.random.normal(k_b1, (intermediate_size,), jnp.float32) * 0.02
    w2 = jax.random.normal(k_w2, (intermediate_size, hidden_size), jnp.float32) * 0.02
    b2 = jax.random.normal(k_b2, (hidden_size,), jnp.float32) * 0.02

    ref = reference_mlp(hidden_states, w1, b1, w2, b2)

    # f32 compute path (tight tolerance).
    out_f32 = siglip_mlp(hidden_states, w1, b1, w2, b2, compute_dtype=jnp.float32)
    out_f32 = jax.block_until_ready(out_f32)
    assert out_f32.shape == (batch, seq, hidden_size)
    assert jnp.allclose(out_f32, ref, atol=1e-4, rtol=1e-4), "f32 mismatch vs. reference"

    # Default production path: bf16 MXU operands, f32 accumulation / bias / GELU.
    out_bf16 = siglip_mlp(hidden_states, w1, b1, w2, b2)
    out_bf16 = jax.block_until_ready(out_bf16)
    assert out_bf16.shape == (batch, seq, hidden_size)
    assert jnp.allclose(out_bf16.astype(jnp.float32), ref, atol=3e-2, rtol=3e-2), \
        "bf16 mismatch vs. reference"

    print("KERNEL_OK")
</pallas_src>

<mosaic_0001>
module attributes {stable_mosaic.version = 11 : i64} {
  func.func @_mlp_kernel_resident(%arg0: i32, %arg1: memref<256x32xf32, #tpu.memory_space<vmem>>, %arg2: memref<32x128xf32, #tpu.memory_space<vmem>>, %arg3: memref<1x128xf32, #tpu.memory_space<vmem>>, %arg4: memref<128x32xf32, #tpu.memory_space<vmem>>, %arg5: memref<1x32xf32, #tpu.memory_space<vmem>>, %arg6: memref<256x32xf32, #tpu.memory_space<vmem>>) attributes {dimension_semantics = [#tpu.dimension_semantics<parallel>], iteration_bounds = array<i64: 1>, scalar_prefetch = 0 : i64, scratch_operands = 0 : i64, tpu.core_type = #tpu.core_type<tc>, window_params = [{transform_indices = @transform_0, window_bounds = array<i64: 256, 32>}, {pipeline_mode = #tpu.pipeline_mode<synchronous>, transform_indices = @transform_1, window_bounds = array<i64: 32, 128>}, {pipeline_mode = #tpu.pipeline_mode<synchronous>, transform_indices = @transform_2, window_bounds = array<i64: 1, 128>}, {pipeline_mode = #tpu.pipeline_mode<synchronous>, transform_indices = @transform_3, window_bounds = array<i64: 128, 32>}, {pipeline_mode = #tpu.pipeline_mode<synchronous>, transform_indices = @transform_4, window_bounds = array<i64: 1, 32>}, {transform_indices = @transform_5, window_bounds = array<i64: 256, 32>}]} {
    %c0 = arith.constant 0 : index
    %c0_0 = arith.constant 0 : index
    %0 = vector.load %arg1[%c0, %c0_0] : memref<256x32xf32, #tpu.memory_space<vmem>>, vector<256x32xf32>
    %c0_1 = arith.constant 0 : index
    %c0_2 = arith.constant 0 : index
    %1 = vector.load %arg2[%c0_1, %c0_2] : memref<32x128xf32, #tpu.memory_space<vmem>>, vector<32x128xf32>
    %cst = arith.constant dense<0.000000e+00> : vector<256x128xf32>
    %2 = tpu.matmul %0, %1, %cst {dimension_numbers = #tpu.dot_dimension_numbers<[1], [0], [0], [1], [0, 0, 1, 1], [], []>} : vector<256x32xf32>, vector<32x128xf32>, vector<256x128xf32> -> vector<256x128xf32>
    %c0_3 = arith.constant 0 : index
    %c0_4 = arith.constant 0 : index
    %3 = vector.load %arg3[%c0_3, %c0_4] : memref<1x128xf32, #tpu.memory_space<vmem>>, vector<1x128xf32>
    %4 = vector.broadcast %3 : vector<1x128xf32> to vector<256x128xf32>
    %5 = arith.addf %2, %4 : vector<256x128xf32>
    %cst_5 = arith.constant 5.000000e-01 : f32
    %6 = vector.broadcast %cst_5 : f32 to vector<256x128xf32>
    %7 = arith.mulf %6, %5 : vector<256x128xf32>
    %cst_6 = arith.constant 4.471500e-02 : f32
    %8 = vector.broadcast %cst_6 : f32 to vector<256x128xf32>
    %9 = arith.mulf %8, %5 : vector<256x128xf32>
    %10 = arith.mulf %9, %5 : vector<256x128xf32>
    %11 = arith.mulf %10, %5 : vector<256x128xf32>
    %12 = arith.addf %5, %11 : vector<256x128xf32>
    %cst_7 = arith.constant 0.797884583 : f32
    %13 = vector.broadcast %cst_7 : f32 to vector<256x128xf32>
    %14 = arith.mulf %13, %12 : vector<256x128xf32>
    %15 = math.tanh %14 : vector<256x128xf32>
    %cst_8 = arith.constant 1.000000e+00 : f32
    %16 = vector.broadcast %cst_8 : f32 to vector<256x128xf32>
    %17 = arith.addf %16, %15 : vector<256x128xf32>
    %18 = arith.mulf %7, %17 : vector<256x128xf32>
    %c0_9 = arith.constant 0 : index
    %c0_10 = arith.constant 0 : index
    %19 = vector.load %arg4[%c0_9, %c0_10] : memref<128x32xf32, #tpu.memory_space<vmem>>, vector<128x32xf32>
    %cst_11 = arith.constant dense<0.000000e+00> : vector<256x32xf32>
    %20 = tpu.matmul %18, %19, %cst_11 {dimension_numbers = #tpu.dot_dimension_numbers<[1], [0], [0], [1], [0, 0, 1, 1], [], []>} : vector<256x128xf32>, vector<128x32xf32>, vector<256x32xf32> -> vector<256x32xf32>
    %c0_12 = arith.constant 0 : index
    %c0_13 = arith.constant 0 : index
    %21 = vector.load %arg5[%c0_12, %c0_13] : memref<1x32xf32, #tpu.memory_space<vmem>>, vector<1x32xf32>
    %22 = vector.broadcast %21 : vector<1x32xf32> to vector<256x32xf32>
    %23 = arith.addf %20, %22 : vector<256x32xf32>
    %c0_14 = arith.constant 0 : index
    %c0_15 = arith.constant 0 : index
    %24 = vector.load %arg6[%c0_14, %c0_15] : memref<256x32xf32, #tpu.memory_space<vmem>>, vector<256x32xf32>
    tpu.vector_store %arg6[%c0_14, %c0_15], %23 {strides = array<i32>} : memref<256x32xf32, #tpu.memory_space<vmem>>, vector<256x32xf32>,
    return
  }
  func.func @transform_0(%arg0: i32) -> (i32, i32) {
    %c0_i32 = arith.constant 0 : i32
    %c0_i32_0 = arith.constant 0 : i32
    return %arg0, %c0_i32 : i32, i32
  }
  func.func @transform_1(%arg0: i32) -> (i32, i32) {
    %c0_i32 = arith.constant 0 : i32
    %c0_i32_0 = arith.constant 0 : i32
    %c0_i32_1 = arith.constant 0 : i32
    return %c0_i32, %c0_i32_0 : i32, i32
  }
  func.func @transform_2(%arg0: i32) -> (i32, i32) {
    %c0_i32 = arith.constant 0 : i32
    %c0_i32_0 = arith.constant 0 : i32
    %c0_i32_1 = arith.constant 0 : i32
    return %c0_i32, %c0_i32_0 : i32, i32
  }
  func.func @transform_3(%arg0: i32) -> (i32, i32) {
    %c0_i32 = arith.constant 0 : i32
    %c0_i32_0 = arith.constant 0 : i32
    %c0_i32_1 = arith.constant 0 : i32
    return %c0_i32, %c0_i32_0 : i32, i32
  }
  func.func @transform_4(%arg0: i32) -> (i32, i32) {
    %c0_i32 = arith.constant 0 : i32
    %c0_i32_0 = arith.constant 0 : i32
    %c0_i32_1 = arith.constant 0 : i32
    return %c0_i32, %c0_i32_0 : i32, i32
  }
  func.func @transform_5(%arg0: i32) -> (i32, i32) {
    %c0_i32 = arith.constant 0 : i32
    %c0_i32_0 = arith.constant 0 : i32
    return %arg0, %c0_i32 : i32, i32
  }
}

</mosaic_0001>

<bundles_post_ra>
// kernel: siglip_mlp.1
= control target key start
LH: loop header
LB: loop body
LE: loop exit
PB: predicated region body
PF: predicated region fallthrough
CT: control target
= control target key end

     0   :  { %vm60_vm0 = vcmask 261120   ;;  %s1387_s1 = inlined_call_operand.vmem [shape: f32[32,128], index: 1, kind: input, shape index: {}]   ;;  %s1388_s0 = inlined_call_operand.vmem [shape: f32[256,32], index: 0, kind: input, shape index: {}]   ;;  %s1389_s2 = inlined_call_operand.vmem [shape: f32[1,128], index: 2, kind: input, shape index: {}]   ;;  %s1390_s3 = inlined_call_operand.vmem [shape: f32[128,32], index: 3, kind: input, shape index: {}]   ;;  %s1391_s4 = inlined_call_operand.vmem [shape: f32[1,32], index: 4, kind: input, shape index: {}]   ;;  %s1392_s5 = inlined_call_operand.vmem [shape: f32[256,32], index: 5, kind: output, shape index: {}]  }
   0x1   :  { %v55_v0 = vld [vmem:[%s1387_s1 + $0x18] sm:$0xff]  ;;  %v54_v1 = vld [vmem:[%s1387_s1 + $0x10] sm:$0xff]  ;;  %v53_v2 = vld [vmem:[%s1387_s1 + $0x8] sm:$0xff] }
   0x2   :  { %169 = vmatpush.msra.mxu0 %v55_v0  ;;  %759 = vmatpush.msra.mxu3 %v55_v0  ;;  %v52_v3 = vld [vmem:[%s1387_s1] sm:$0xff]  ;;  %v21_v5 = vld [vmem:[%s1388_s0 + $0x8] sm:$0xff]  ;;  %v22_v6 = vld [vmem:[%s1388_s0 + $0x10] sm:$0xff] }
   0x3   :  { %v20_v4 = vld [vmem:[%s1388_s0] sm:$0xff]  ;;  %v23_v7 = vld [vmem:[%s1388_s0 + $0x18] sm:$0xff]  ;;  %v25_v9 = vld [vmem:[%s1388_s0 + $0x28] sm:$0xff] }
   0x4   :  { %170 = vmatpush.msra.mxu0 %v54_v1  ;;  %760 = vmatpush.msra.mxu3 %v54_v1  ;;  %v24_v8 = vld [vmem:[%s1388_s0 + $0x20] sm:$0xff]  ;;  %v26_v10 = vld [vmem:[%s1388_s0 + $0x30] sm:$0xff]  ;;  %v27_v11 = vld [vmem:[%s1388_s0 + $0x38] sm:$0xff] }
   0x5   :  { %v28_v12 = vld [vmem:[%s1388_s0 + $0x40] sm:$0xff]  ;;  %v29_v13 = vld [vmem:[%s1388_s0 + $0x48] sm:$0xff]  ;;  %v38_v14 = vld [vmem:[%s1388_s0 + $0x90] sm:$0xff] }
   0x6   :  { %171 = vmatpush.msra.mxu0 %v53_v2  ;;  %761 = vmatpush.msra.mxu3 %v53_v2  ;;  %v30_v15 = vld [vmem:[%s1388_s0 + $0x50] sm:$0xff]  ;;  %v39_v16 = vld [vmem:[%s1388_s0 + $0x98] sm:$0xff]  ;;  %v40_v20 = vld [vmem:[%s1388_s0 + $0xa0] sm:$0xff] }
   0x7   :  { %v573_v17 = vld [vmem:[%s1390_s3 + $0x78] sm:$0xff]  ;;  %v572_v19 = vld [vmem:[%s1390_s3 + $0x70] sm:$0xff]  ;;  %v571_v21 = vld [vmem:[%s1390_s3 + $0x68] sm:$0xff] }
   0x8   :  { %172 = vmatpush.msra.mxu0 %v52_v3  ;;  %762 = vmatpush.msra.mxu3 %v52_v3  ;;  %v31_v18 = vld [vmem:[%s1388_s0 + $0x58] sm:$0xff]  ;;  %v570_v22 = vld [vmem:[%s1390_s3 + $0x60] sm:$0xff]  ;;  %v568_v25 = vld [vmem:[%s1390_s3 + $0x50] sm:$0xff] }
   0x9   :  { %727 = vmatmul.msk.f32.vlgmr.msra.gmra.mxu0 %vm60_vm0, %v20_v4  ;;  %745 = vmatmul.msk.f32.vlgmr.msra.gmra.mxu3 %vm60_vm0, %v38_v14  ;;  %v32_v23 = vld [vmem:[%s1388_s0 + $0x60] sm:$0xff]  ;;  %v569_v24 = vld [vmem:[%s1390_s3 + $0x58] sm:$0xff]  ;;  %v41_v26 = vld [vmem:[%s1388_s0 + $0xa8] sm:$0xff] }
   0xa   :  { %578 = vmatpush.msra.mxu1 %v573_v17  ;;  %763 = vmatpush.msra.mxu2 %v573_v17  ;;  %v567_v27 = vld [vmem:[%s1390_s3 + $0x48] sm:$0xff]  ;;  %v566_v28 = vld [vmem:[%s1390_s3 + $0x40] sm:$0xff]  ;;  %v565_v30 = vld [vmem:[%s1390_s3 + $0x38] sm:$0xff] }
   0xb   :  { %764 = vmatpush.msrb.mxu3 %v573_v17  ;;  %v33_v29 = vld [vmem:[%s1388_s0 + $0x68] sm:$0xff]  ;;  %v564_v31 = vld [vmem:[%s1390_s3 + $0x30] sm:$0xff]  ;;  %v562_v34 = vld [vmem:[%s1390_s3 + $0x20] sm:$0xff] }
   0xc   :  { %579 = vmatpush.msra.mxu1 %v572_v19  ;;  %765 = vmatpush.msra.mxu2 %v572_v19  ;;  %v42_v32 = vld [vmem:[%s1388_s0 + $0xb0] sm:$0xff]  ;;  %v563_v33 = vld [vmem:[%s1390_s3 + $0x28] sm:$0xff]  ;;  %v561_v36 = vld [vmem:[%s1390_s3 + $0x18] sm:$0xff] }
   0xd   :  { %766 = vmatpush.msrb.mxu3 %v572_v19  ;;  %v34_v35 = vld [vmem:[%s1388_s0 + $0x70] sm:$0xff]  ;;  %v43_v38 = vld [vmem:[%s1388_s0 + $0xb8] sm:$0xff]  ;;  %v559_v39 = vld [vmem:[%s1390_s3 + $0x8] sm:$0xff] }
   0xe   :  { %580 = vmatpush.msra.mxu1 %v571_v21  ;;  %767 = vmatpush.msra.mxu2 %v571_v21  ;;  %v560_v37 = vld [vmem:[%s1390_s3 + $0x10] sm:$0xff]  ;;  %v558_v40 = vld [vmem:[%s1390_s3] sm:$0xff]  ;;  %v35_v41 = vld [vmem:[%s1388_s0 + $0x78] sm:$0xff] }
   0xf   :  { %768 = vmatpush.msrb.mxu3 %v571_v21  ;;  %v44_v42 = vld [vmem:[%s1388_s0 + $0xc0] sm:$0xff]  ;;  %v45_v47 = vld [vmem:[%s1388_s0 + $0xc8] sm:$0xff]  ;;  %v46_v55 = vld [vmem:[%s1388_s0 + $0xd0] sm:$0xff] }
  0x10   :  { %581 = vmatpush.msra.mxu1 %v570_v22  ;;  %769 = vmatpush.msra.mxu2 %v570_v22  ;;  %v1046_v43 = vld [vmem:[%s1389_s2] ss:$0 sm:$0xff]  ;;  %v37_v52 = vld [vmem:[%s1388_s0 + $0x88] sm:$0xff]  ;;  %v47_v63 = vld [vmem:[%s1388_s0 + $0xd8] sm:$0xff] }
  0x11   :  { %728 = vmatmul.msk.f32.gmra.mxu0 %vm60_vm0, %v21_v5  ;;  %746 = vmatmul.msk.f32.gmra.mxu3 %vm60_vm0, %v39_v16  ;;  %v36_v45 = vld [vmem:[%s1388_s0 + $0x80] sm:$0xff] }
  0x12   :  { %582 = vmatpush.msra.mxu1 %v569_v24  ;;  %770 = vmatpush.msrb.mxu3 %v570_v22 }
  0x13   :  { %771 = vmatpush.msra.mxu2 %v569_v24 }
  0x14   :  { %583 = vmatpush.msra.mxu1 %v568_v25  ;;  %772 = vmatpush.msrb.mxu3 %v569_v24 }
  0x15   :  { %773 = vmatpush.msra.mxu2 %v568_v25 }
  0x16   :  { %584 = vmatpush.msra.mxu1 %v567_v27  ;;  %774 = vmatpush.msrb.mxu3 %v568_v25 }
  0x17   :  { %775 = vmatpush.msra.mxu2 %v567_v27 }
  0x18   :  { %585 = vmatpush.msra.mxu1 %v566_v28  ;;  %776 = vmatpush.msrb.mxu3 %v567_v27 }
  0x19   :  { %729 = vmatmul.msk.f32.gmra.mxu0 %vm60_vm0, %v22_v6  ;;  %747 = vmatmul.msk.f32.gmra.mxu3 %vm60_vm0, %v40_v20 }
  0x1a   :  { %777 = vmatpush.msra.mxu2 %v566_v28  ;;  %586 = vmatpush.msra.mxu1 %v565_v30 }
  0x1b   :  { %778 = vmatpush.msrb.mxu3 %v566_v28 }
  0x1c   :  { %779 = vmatpush.msra.mxu2 %v565_v30  ;;  %587 = vmatpush.msra.mxu1 %v564_v31 }
  0x1d   :  { %780 = vmatpush.msrb.mxu3 %v565_v30 }
  0x1e   :  { %781 = vmatpush.msra.mxu2 %v564_v31  ;;  %588 = vmatpush.msra.mxu1 %v563_v33 }
  0x1f   :  { %782 = vmatpush.msrb.mxu3 %v564_v31 }
  0x20   :  { %783 = vmatpush.msra.mxu2 %v563_v33  ;;  %589 = vmatpush.msra.mxu1 %v562_v34 }
  0x21   :  { %730 = vmatmul.msk.f32.gmra.mxu0 %vm60_vm0, %v23_v7  ;;  %748 = vmatmul.msk.f32.gmra.mxu3 %vm60_vm0, %v41_v26 }
  0x22   :  { %785 = vmatpush.msra.mxu2 %v562_v34  ;;  %590 = vmatpush.msra.mxu1 %v561_v36 }
  0x23   :  { %784 = vmatpush.msrb.mxu3 %v563_v33 }
  0x24   :  { %787 = vmatpush.msra.mxu2 %v561_v36  ;;  %591 = vmatpush.msra.mxu1 %v560_v37 }
  0x25   :  { %786 = vmatpush.msrb.mxu3 %v562_v34 }
  0x26   :  { %789 = vmatpush.msra.mxu2 %v560_v37  ;;  %592 = vmatpush.msra.mxu1 %v559_v39 }
  0x27   :  { %788 = vmatpush.msrb.mxu3 %v561_v36 }
  0x28   :  { %791 = vmatpush.msra.mxu2 %v559_v39  ;;  %593 = vmatpush.msra.mxu1 %v558_v40 }
  0x29   :  { %731 = vmatmul.msk.f32.gmra.mxu0 %vm60_vm0, %v24_v8  ;;  %749 = vmatmul.msk.f32.gmra.mxu3 %vm60_vm0, %v42_v32 }
  0x2a   :  { %793 = vmatpush.msra.mxu2 %v558_v40  ;;  %790 = vmatpush.msrb.mxu3 %v560_v37 }
  0x2c   :  { %792 = vmatpush.msrb.mxu3 %v559_v39 }
  0x2e   :  { %794 = vmatpush.msrb.mxu3 %v558_v40 }
  0x31   :  { %732 = vmatmul.msk.f32.gmra.mxu0 %vm60_vm0, %v25_v9  ;;  %750 = vmatmul.msk.f32.gmra.mxu3 %vm60_vm0, %v43_v38 }
  0x39   :  { %733 = vmatmul.msk.f32.gmra.mxu0 %vm60_vm0, %v26_v10  ;;  %751 = vmatmul.msk.f32.gmra.mxu3 %vm60_vm0, %v44_v42 }
  0x41   :  { %734 = vmatmul.msk.f32.gmra.mxu0 %vm60_vm0, %v27_v11  ;;  %752 = vmatmul.msk.f32.gmra.mxu3 %vm60_vm0, %v45_v47  ;;  %v48_v11 = vld [vmem:[%s1388_s0 + $0xe0] sm:$0xff] }
  0x49   :  { %735 = vmatmul.msk.f32.gmra.mxu0 %vm60_vm0, %v28_v12  ;;  %753 = vmatmul.msk.f32.gmra.mxu3 %vm60_vm0, %v46_v55 }
  0x51   :  { %736 = vmatmul.msk.f32.gmra.mxu0 %vm60_vm0, %v29_v13  ;;  %754 = vmatmul.msk.f32.gmra.mxu3 %vm60_vm0, %v47_v63 }
  0x59   :  { %737 = vmatmul.msk.f32.gmra.mxu0 %vm60_vm0, %v30_v15  ;;  %755 = vmatmul.msk.f32.gmra.mxu3 %vm60_vm0, %v48_v11 }
  0x61   :  { %738 = vmatmul.msk.f32.gmra.mxu0 %vm60_vm0, %v31_v18 }
  0x69   :  { %739 = vmatmul.msk.f32.gmra.mxu0 %vm60_vm0, %v32_v23  ;;  %v49_v23 = vld [vmem:[%s1388_s0 + $0xe8] sm:$0xff] }
  0x6a   :  { %756 = vmatmul.msk.f32.gmra.mxu3 %vm60_vm0, %v49_v23 }
  0x71   :  { %740 = vmatmul.msk.f32.gmra.mxu0 %vm60_vm0, %v33_v29 }
  0x79   :  { %741 = vmatmul.msk.f32.gmra.mxu0 %vm60_vm0, %v34_v35  ;;  %v50_v35 = vld [vmem:[%s1388_s0 + $0xf0] sm:$0xff] }
  0x7a   :  { %757 = vmatmul.msk.f32.gmra.mxu3 %vm60_vm0, %v50_v35 }
  0x81   :  { %742 = vmatmul.msk.f32.gmra.mxu0 %vm60_vm0, %v35_v41 }
  0x86   :  { %v174_v44 = vpop.f32.mrf.mxu0 }
  0x87   :  { %v175_v46 = vadd.f32 %v1046_v43, %v174_v44 }
  0x89   :  { %743 = vmatmul.msk.f32.gmra.mxu0 %vm60_vm0, %v36_v45  ;;  %v302_v48 = vmul.f32 0.044715, %v175_v46  ;;  %v270_v3 = vmul.f32 0.5, %v175_v46 }
  0x8b   :  { %v334_v49 = vmul.f32 %v302_v48, %v175_v46  ;;  %v51_v48 = vld [vmem:[%s1388_s0 + $0xf8] sm:$0xff] }
  0x8c   :  { %758 = vmatmul.msk.f32.gmra.mxu3 %vm60_vm0, %v51_v48 }
  0x8d   :  { %v366_v50 = vmul.f32 %v334_v49, %v175_v46 }
  0x8e   :  { %v177_v51 = vpop.f32.mrf.mxu0 }
  0x8f   :  { %v178_v53 = vadd.f32 %v1046_v43, %v177_v51  ;;  %v398_v54 = vadd.f32 %v366_v50, %v175_v46 }
  0x91   :  { %744 = vmatmul.msk.f32.gmra.mxu0 %vm60_vm0, %v37_v52  ;;  %v430_v56 = vmul.f32 0.7978846, %v398_v54  ;;  %v303_v57 = vmul.f32 0.044715, %v178_v53  ;;  %v271_v15 = vmul.f32 0.5, %v178_v53 }
  0x93   :  { %797 = vtanh.f32 %v430_v56  ;;  %v335_v58 = vmul.f32 %v303_v57, %v178_v53 }
  0x95   :  { %v367_v59 = vmul.f32 %v335_v58, %v178_v53 }
  0x96   :  { %v180_v60 = vpop.f32.mrf.mxu0 }
  0x97   :  { %v181_v61 = vadd.f32 %v1046_v43, %v180_v60  ;;  %v399_v62 = vadd.f32 %v367_v59, %v178_v53 }
  0x99   :  { %v798_v0 = vpop.eup %797  ;;  %v431_v1 = vmul.f32 0.7978846, %v399_v62  ;;  %v304_v2 = vmul.f32 0.044715, %v181_v61  ;;  %v272_v27 = vmul.f32 0.5, %v181_v61 }
  0x9a   :  { %v494_v4 = vadd.f32 1.0, %v798_v0 }
  0x9b   :  { %799 = vtanh.f32 %v431_v1  ;;  %v336_v5 = vmul.f32 %v304_v2, %v181_v61 }
  0x9c   :  { %v526_v6 = vmul.f32 %v494_v4, %v270_v3 }
  0x9d   :  { %v368_v7 = vmul.f32 %v336_v5, %v181_v61 }
  0x9e   :  { %v183_v8 = vpop.f32.mrf.mxu0  ;;  %594 = vmatmul.f32.vlgmr.msra.gmra.mxu1 %v526_v6 }
  0x9f   :  { %v184_v9 = vadd.f32 %v1046_v43, %v183_v8  ;;  %v400_v10 = vadd.f32 %v368_v7, %v181_v61 }
  0xa1   :  { %v800_v12 = vpop.eup %799  ;;  %v432_v13 = vmul.f32 0.7978846, %v400_v10  ;;  %v305_v14 = vmul.f32 0.044715, %v184_v9  ;;  %v273_v39 = vmul.f32 0.5, %v184_v9 }
  0xa2   :  { %v495_v16 = vadd.f32 1.0, %v800_v12 }
  0xa3   :  { %801 = vtanh.f32 %v432_v13  ;;  %v337_v17 = vmul.f32 %v305_v14, %v184_v9 }
  0xa4   :  { %v527_v18 = vmul.f32 %v495_v16, %v271_v15 }
  0xa5   :  { %v369_v19 = vmul.f32 %v337_v17, %v184_v9 }
  0xa6   :  { %v186_v20 = vpop.f32.mrf.mxu0  ;;  %597 = vmatmul.f32.gmra.mxu1 %v527_v18 }
  0xa7   :  { %v187_v21 = vadd.f32 %v1046_v43, %v186_v20  ;;  %v401_v22 = vadd.f32 %v369_v19, %v184_v9 }
  0xa9   :  { %v802_v24 = vpop.eup %801  ;;  %v433_v25 = vmul.f32 0.7978846, %v401_v22  ;;  %v306_v26 = vmul.f32 0.044715, %v187_v21  ;;  %v274_v52 = vmul.f32 0.5, %v187_v21 }
  0xaa   :  { %v496_v28 = vadd.f32 1.0, %v802_v24 }
  0xab   :  { %803 = vtanh.f32 %v433_v25  ;;  %v338_v29 = vmul.f32 %v306_v26, %v187_v21  ;;  %v1094_v26 = vpop.f32.mrf.mxu3 }
  0xac   :  { %v528_v30 = vmul.f32 %v496_v28, %v272_v27 }
  0xad   :  { %v370_v31 = vmul.f32 %v338_v29, %v187_v21 }
  0xae   :  { %v189_v32 = vpop.f32.mrf.mxu0  ;;  %600 = vmatmul.f32.gmra.mxu1 %v528_v30 }
  0xaf   :  { %v190_v33 = vadd.f32 %v1046_v43, %v189_v32  ;;  %v402_v34 = vadd.f32 %v370_v31, %v187_v21 }
  0xb1   :  { %v804_v36 = vpop.eup %803  ;;  %v434_v37 = vmul.f32 0.7978846, %v402_v34  ;;  %v307_v38 = vmul.f32 0.044715, %v190_v33  ;;  %v275_v63 = vmul.f32 0.5, %v190_v33 }
  0xb2   :  { %v497_v40 = vadd.f32 1.0, %v804_v36 }
  0xb3   :  { %805 = vtanh.f32 %v434_v37  ;;  %v339_v41 = vmul.f32 %v307_v38, %v190_v33  ;;  %v1097_v38 = vpop.f32.mrf.mxu3 }
  0xb4   :  { %v529_v42 = vmul.f32 %v497_v40, %v273_v39 }
  0xb5   :  { %v371_v44 = vmul.f32 %v339_v41, %v190_v33 }
  0xb6   :  { %v192_v45 = vpop.f32.mrf.mxu0  ;;  %603 = vmatmul.f32.gmra.mxu1 %v529_v42 }
  0xb7   :  { %v193_v46 = vadd.f32 %v1046_v43, %v192_v45  ;;  %v403_v47 = vadd.f32 %v371_v44, %v190_v33 }
  0xb9   :  { %v806_v49 = vpop.eup %805  ;;  %v435_v50 = vmul.f32 0.7978846, %v403_v47  ;;  %v308_v51 = vmul.f32 0.044715, %v193_v46  ;;  %v276_v10 = vmul.f32 0.5, %v193_v46 }
  0xba   :  { %v498_v53 = vadd.f32 1.0, %v806_v49 }
  0xbb   :  { %807 = vtanh.f32 %v435_v50  ;;  %v340_v54 = vmul.f32 %v308_v51, %v193_v46  ;;  %v1100_v51 = vpop.f32.mrf.mxu3 }
  0xbc   :  { %v530_v55 = vmul.f32 %v498_v53, %v274_v52 }
  0xbd   :  { %v372_v56 = vmul.f32 %v340_v54, %v193_v46 }
  0xbe   :  { %v195_v57 = vpop.f32.mrf.mxu0  ;;  %606 = vmatmul.f32.gmra.mxu1 %v530_v55 }
  0xbf   :  { %v196_v58 = vadd.f32 %v1046_v43, %v195_v57  ;;  %v404_v59 = vadd.f32 %v372_v56, %v193_v46 }
  0xc1   :  { %v808_v60 = vpop.eup %807  ;;  %v436_v61 = vmul.f32 0.7978846, %v404_v59  ;;  %v309_v62 = vmul.f32 0.044715, %v196_v58  ;;  %v277_v21 = vmul.f32 0.5, %v196_v58 }
  0xc2   :  { %v499_v0 = vadd.f32 1.0, %v808_v60 }
  0xc3   :  { %809 = vtanh.f32 %v436_v61  ;;  %v341_v1 = vmul.f32 %v309_v62, %v196_v58 }
  0xc4   :  { %v531_v2 = vmul.f32 %v499_v0, %v275_v63  ;;  %v1103_v63 = vpop.f32.mrf.mxu3 }
  0xc5   :  { %v373_v3 = vmul.f32 %v341_v1, %v196_v58 }
  0xc6   :  { %v198_v4 = vpop.f32.mrf.mxu0  ;;  %609 = vmatmul.f32.gmra.mxu1 %v531_v2 }
  0xc7   :  { %v199_v5 = vadd.f32 %v1046_v43, %v198_v4  ;;  %v405_v6 = vadd.f32 %v373_v3, %v196_v58 }
  0xc9   :  { %v810_v7 = vpop.eup %809  ;;  %v437_v8 = vmul.f32 0.7978846, %v405_v6  ;;  %v310_v9 = vmul.f32 0.044715, %v199_v5  ;;  %v278_v33 = vmul.f32 0.5, %v199_v5 }
  0xca   :  { %v500_v11 = vadd.f32 1.0, %v810_v7 }
  0xcb   :  { %811 = vtanh.f32 %v437_v8  ;;  %v342_v12 = vmul.f32 %v310_v9, %v199_v5 }
  0xcc   :  { %v532_v13 = vmul.f32 %v500_v11, %v276_v10  ;;  %v1106_v11 = vpop.f32.mrf.mxu3 }
  0xcd   :  { %v374_v14 = vmul.f32 %v342_v12, %v199_v5 }
  0xce   :  { %v201_v15 = vpop.f32.mrf.mxu0  ;;  %612 = vmatmul.f32.gmra.mxu1 %v532_v13 }
  0xcf   :  { %v202_v16 = vadd.f32 %v1046_v43, %v201_v15  ;;  %v406_v17 = vadd.f32 %v374_v14, %v199_v5 }
  0xd1   :  { %v812_v18 = vpop.eup %811  ;;  %v438_v19 = vmul.f32 0.7978846, %v406_v17  ;;  %v311_v20 = vmul.f32 0.044715, %v202_v16  ;;  %v279_v46 = vmul.f32 0.5, %v202_v16 }
  0xd2   :  { %v501_v22 = vadd.f32 1.0, %v812_v18 }
  0xd3   :  { %813 = vtanh.f32 %v438_v19  ;;  %v343_v23 = vmul.f32 %v311_v20, %v202_v16 }
  0xd4   :  { %v533_v24 = vmul.f32 %v501_v22, %v277_v21 }
  0xd5   :  { %v375_v25 = vmul.f32 %v343_v23, %v202_v16  ;;  %v1109_v23 = vpop.f32.mrf.mxu3 }
  0xd6   :  { %v204_v27 = vpop.f32.mrf.mxu0  ;;  %615 = vmatmul.f32.gmra.mxu1 %v533_v24 }
  0xd7   :  { %v205_v28 = vadd.f32 %v1046_v43, %v204_v27  ;;  %v407_v29 = vadd.f32 %v375_v25, %v202_v16 }
  0xd9   :  { %v814_v30 = vpop.eup %813  ;;  %v439_v31 = vmul.f32 0.7978846, %v407_v29  ;;  %v312_v32 = vmul.f32 0.044715, %v205_v28  ;;  %v280_v58 = vmul.f32 0.5, %v205_v28 }
  0xda   :  { %v502_v34 = vadd.f32 1.0, %v814_v30 }
  0xdb   :  { %815 = vtanh.f32 %v439_v31  ;;  %v344_v35 = vmul.f32 %v312_v32, %v205_v28 }
  0xdc   :  { %v534_v36 = vmul.f32 %v502_v34, %v278_v33 }
  0xdd   :  { %v376_v37 = vmul.f32 %v344_v35, %v205_v28 }
  0xde   :  { %v207_v39 = vpop.f32.mrf.mxu0  ;;  %618 = vmatmul.f32.gmra.mxu1 %v534_v36  ;;  %v1112_v36 = vpop.f32.mrf.mxu3 }
  0xdf   :  { %v208_v40 = vadd.f32 %v1046_v43, %v207_v39  ;;  %v408_v41 = vadd.f32 %v376_v37, %v205_v28  ;;  %v1116_v39 = vadd.f32 %v1046_v43, %v1094_v26  ;;  %v1124_v26 = vadd.f32 %v1046_v43, %v1097_v38 }
  0xe1   :  { %v816_v42 = vpop.eup %815  ;;  %v440_v44 = vmul.f32 0.7978846, %v408_v41  ;;  %v313_v45 = vmul.f32 0.044715, %v208_v40  ;;  %v281_v6 = vmul.f32 0.5, %v208_v40 }
  0xe2   :  { %v503_v47 = vadd.f32 1.0, %v816_v42 }
  0xe3   :  { %817 = vtanh.f32 %v440_v44  ;;  %v345_v48 = vmul.f32 %v313_v45, %v208_v40 }
  0xe4   :  { %v535_v49 = vmul.f32 %v503_v47, %v279_v46 }
  0xe5   :  { %v377_v50 = vmul.f32 %v345_v48, %v208_v40 }
  0xe6   :  { %v210_v52 = vpop.f32.mrf.mxu0  ;;  %621 = vmatmul.f32.gmra.mxu1 %v535_v49  ;;  %v320_v49 = vmul.f32 0.044715, %v1116_v39 }
  0xe7   :  { %v211_v53 = vadd.f32 %v1046_v43, %v210_v52  ;;  %v409_v54 = vadd.f32 %v377_v50, %v208_v40 }
  0xe9   :  { %v818_v55 = vpop.eup %817  ;;  %v441_v56 = vmul.f32 0.7978846, %v409_v54  ;;  %v314_v57 = vmul.f32 0.044715, %v211_v53  ;;  %v282_v18 = vmul.f32 0.5, %v211_v53 }
  0xea   :  { %v504_v59 = vadd.f32 1.0, %v818_v55 }
  0xeb   :  { %819 = vtanh.f32 %v441_v56  ;;  %v346_v60 = vmul.f32 %v314_v57, %v211_v53  ;;  %v352_v57 = vmul.f32 %v320_v49, %v1116_v39 }
  0xec   :  { %v536_v61 = vmul.f32 %v504_v59, %v280_v58 }
  0xed   :  { %v378_v62 = vmul.f32 %v346_v60, %v211_v53 }
  0xee   :  { %v213_v0 = vpop.f32.mrf.mxu0  ;;  %624 = vmatmul.f32.gmra.mxu1 %v536_v61 }
  0xef   :  { %v214_v1 = vadd.f32 %v1046_v43, %v213_v0  ;;  %v410_v2 = vadd.f32 %v378_v62, %v211_v53  ;;  %v1120_v53 = vpop.f32.mrf.mxu3 }
  0xf1   :  { %v820_v3 = vpop.eup %819  ;;  %v442_v4 = vmul.f32 0.7978846, %v410_v2  ;;  %v315_v5 = vmul.f32 0.044715, %v214_v1  ;;  %v283_v31 = vmul.f32 0.5, %v214_v1 }
  0xf2   :  { %v505_v7 = vadd.f32 1.0, %v820_v3  ;;  %v321_v2 = vmul.f32 0.044715, %v1124_v26 }
  0xf3   :  { %821 = vtanh.f32 %v442_v4  ;;  %v347_v8 = vmul.f32 %v315_v5, %v214_v1  ;;  %v1134_v5 = vadd.f32 %v1046_v43, %v1100_v51 }
  0xf4   :  { %v537_v9 = vmul.f32 %v505_v7, %v281_v6 }
  0xf5   :  { %v379_v10 = vmul.f32 %v347_v8, %v214_v1  ;;  %v353_v8 = vmul.f32 %v321_v2, %v1124_v26  ;;  %v1200_v2 = vadd.f32 %v1046_v43, %v1112_v36 }
  0xf6   :  { %v216_v12 = vpop.f32.mrf.mxu0  ;;  %627 = vmatmul.f32.gmra.mxu1 %v537_v9  ;;  %v1141_v9 = vld [vmem:[%s1391_s4] ss:$0 sm:$0xff] }
  0xf7   :  { %v217_v13 = vadd.f32 %v1046_v43, %v216_v12  ;;  %v411_v14 = vadd.f32 %v379_v10, %v214_v1  ;;  %v384_v1 = vmul.f32 %v352_v57, %v1116_v39  ;;  %v1130_v38 = vpop.f32.mrf.mxu3  ;;  %v385_v51 = vmul.f32 %v353_v8, %v1124_v26 }
  0xf9   :  { %v822_v15 = vpop.eup %821  ;;  %v443_v16 = vmul.f32 0.7978846, %v411_v14  ;;  %v316_v17 = vmul.f32 0.044715, %v217_v13  ;;  %v284_v46 = vmul.f32 0.5, %v217_v13  ;;  %v416_v7 = vadd.f32 %v384_v1, %v1116_v39 }
  0xfa   :  { %v506_v19 = vadd.f32 1.0, %v822_v15 }
  0xfb   :  { %823 = vtanh.f32 %v443_v16  ;;  %v348_v20 = vmul.f32 %v316_v17, %v217_v13  ;;  %v448_v16 = vmul.f32 0.7978846, %v416_v7  ;;  %v322_v17 = vmul.f32 0.044715, %v1134_v5 }
  0xfc   :  { %v538_v21 = vmul.f32 %v506_v19, %v282_v18 }
  0xfd   :  { %v380_v22 = vmul.f32 %v348_v20, %v217_v13 }
  0xfe   :  { %v219_v24 = vpop.f32.mrf.mxu0  ;;  %630 = vmatmul.f32.gmra.mxu1 %v538_v21  ;;  %v1154_v21 = vadd.f32 %v1046_v43, %v1103_v63 }
  0xff   :  { %v220_v25 = vadd.f32 %v1046_v43, %v219_v24  ;;  %v412_v27 = vadd.f32 %v380_v22, %v217_v13  ;;  %v1146_v20 = vpop.f32.mrf.mxu3  ;;  %v417_v22 = vadd.f32 %v385_v51, %v1124_v26  ;;  %v354_v24 = vmul.f32 %v322_v17, %v1134_v5 }
 0x101   :  { %v824_v28 = vpop.eup %823  ;;  %v444_v29 = vmul.f32 0.7978846, %v412_v27  ;;  %v317_v30 = vmul.f32 0.044715, %v220_v25  ;;  %v285_v61 = vmul.f32 0.5, %v220_v25 }
 0x102   :  { %v507_v32 = vadd.f32 1.0, %v824_v28 }
 0x103   :  { %825 = vtanh.f32 %v444_v29  ;;  %v349_v33 = vmul.f32 %v317_v30, %v220_v25  ;;  %v449_v30 = vmul.f32 0.7978846, %v417_v22  ;;  %v1215_v22 = vadd.f32 %v1046_v43, %v1120_v53 }
 0x104   :  { %v539_v34 = vmul.f32 %v507_v32, %v283_v31  ;;  %v386_v31 = vmul.f32 %v354_v24, %v1134_v5  ;;  %v323_v32 = vmul.f32 0.044715, %v1154_v21 }
 0x105   :  { %v381_v35 = vmul.f32 %v349_v33, %v220_v25 }
 0x106   :  { %v222_v37 = vpop.f32.mrf.mxu0  ;;  %633 = vmatmul.f32.gmra.mxu1 %v539_v34 }
 0x107   :  { %v223_v40 = vadd.f32 %v1046_v43, %v222_v37  ;;  %v413_v41 = vadd.f32 %v381_v35, %v220_v25  ;;  %v1161_v63 = vpop.f32.mrf.mxu3  ;;  %v1169_v37 = vadd.f32 %v1046_v43, %v1106_v11 }
 0x109   :  { %v826_v42 = vpop.eup %825  ;;  %v445_v44 = vmul.f32 0.7978846, %v413_v41  ;;  %v318_v45 = vmul.f32 0.044715, %v223_v40  ;;  %v286_v13 = vmul.f32 0.5, %v223_v40  ;;  %v355_v41 = vmul.f32 %v323_v32, %v1154_v21 }
 0x10a   :  { %v508_v47 = vadd.f32 1.0, %v826_v42  ;;  %v288_v42 = vmul.f32 0.5, %v1116_v39  ;;  %v1185_v39 = vadd.f32 %v1046_v43, %v1109_v23 }
 0x10b   :  { %827 = vtanh.f32 %v445_v44  ;;  %v350_v48 = vmul.f32 %v318_v45, %v223_v40 }
 0x10c   :  { %v540_v50 = vmul.f32 %v508_v47, %v284_v46  ;;  %v387_v47 = vmul.f32 %v355_v41, %v1154_v21 }
 0x10d   :  { %v382_v52 = vmul.f32 %v350_v48, %v223_v40  ;;  %v324_v48 = vmul.f32 0.044715, %v1169_v37 }
 0x10e   :  { %v225_v54 = vpop.f32.mrf.mxu0  ;;  %636 = vmatmul.f32.gmra.mxu1 %v540_v50 }
 0x10f   :  { %v226_v55 = vadd.f32 %v1046_v43, %v225_v54  ;;  %v414_v56 = vadd.f32 %v382_v52, %v223_v40  ;;  %v418_v40 = vadd.f32 %v386_v31, %v1134_v5  ;;  %v1177_v11 = vpop.f32.mrf.mxu3  ;;  %v419_v54 = vadd.f32 %v387_v47, %v1154_v21 }
 0x111   :  { %v828_v58 = vpop.eup %827  ;;  %v446_v59 = vmul.f32 0.7978846, %v414_v56  ;;  %v319_v60 = vmul.f32 0.044715, %v226_v55  ;;  %v287_v27 = vmul.f32 0.5, %v226_v55  ;;  %v289_v56 = vmul.f32 0.5, %v1124_v26 }
 0x112   :  { %v509_v62 = vadd.f32 1.0, %v828_v58  ;;  %v450_v46 = vmul.f32 0.7978846, %v418_v40 }
 0x113   :  { %829 = vtanh.f32 %v446_v59  ;;  %v351_v0 = vmul.f32 %v319_v60, %v226_v55  ;;  %v451_v59 = vmul.f32 0.7978846, %v419_v54 }
 0x114   :  { %v541_v3 = vmul.f32 %v509_v62, %v285_v61  ;;  %v325_v61 = vmul.f32 0.044715, %v1185_v39 }
 0x115   :  { %v383_v4 = vmul.f32 %v351_v0, %v226_v55 }
 0x116   :  { %639 = vmatmul.f32.vlgmr.msra.gmra.mxu2 %v541_v3 }
 0x117   :  { %v415_v6 = vadd.f32 %v383_v4, %v226_v55  ;;  %v356_v55 = vmul.f32 %v324_v48, %v1169_v37  ;;  %v264_v23 = vpop.f32.mrf.mxu3  ;;  %v357_v4 = vmul.f32 %v325_v61, %v1185_v39  ;;  %v292_v48 = vmul.f32 0.5, %v1169_v37 }
 0x118   :  { %v265_v26 = vadd.f32 %v1046_v43, %v264_v23  ;;  %v293_v23 = vmul.f32 0.5, %v1185_v39 }
 0x119   :  { %v830_v10 = vpop.eup %829  ;;  %v447_v12 = vmul.f32 0.7978846, %v415_v6  ;;  %v388_v60 = vmul.f32 %v356_v55, %v1169_v37  ;;  %v290_v6 = vmul.f32 0.5, %v1134_v5 }
 0x11a   :  { %v510_v14 = vadd.f32 1.0, %v830_v10  ;;  %v332_v8 = vmul.f32 0.044715, %v265_v26 }
 0x11b   :  { %v595_v15 = vpop.f32.mrf.mxu1  ;;  %831 = vtanh.f32 %v447_v12  ;;  %v420_v3 = vadd.f32 %v388_v60, %v1169_v37  ;;  %v1243_v37 = vadd.f32 %v1046_v43, %v1146_v20 }
 0x11c   :  { %v596_v18 = vadd.f32 %v1141_v9, %v595_v15  ;;  %v542_v19 = vmul.f32 %v510_v14, %v286_v13  ;;  %833 = vtanh.f32 %v448_v16  ;;  %v364_v10 = vmul.f32 %v332_v8, %v265_v26 }
 0x11d   :  { %835 = vtanh.f32 %v449_v30  ;;  %v452_v13 = vmul.f32 0.7978846, %v420_v3  ;;  %v389_v14 = vmul.f32 %v357_v4, %v1185_v39  ;;  %v326_v15 = vmul.f32 0.044715, %v1200_v2 }
 0x11e   :  { %691 = vst.msk [vmem:[%s1392_s5] sm:$0xff] %vm60_vm0, %v596_v18  ;;  %642 = vmatmul.f32.gmra.mxu2 %v542_v19  ;;  %837 = vtanh.f32 %v450_v46  ;;  %v396_v51 = vmul.f32 %v364_v10, %v265_v26 }
 0x11f   :  { %839 = vtanh.f32 %v451_v59  ;;  %v267_v18 = vpop.f32.mrf.mxu3  ;;  %v421_v24 = vadd.f32 %v389_v14, %v1185_v39  ;;  %v259_v39 = vadd.f32 %v1046_v43, %v1161_v63  ;;  %v262_v63 = vadd.f32 %v1046_v43, %v1177_v11 }
 0x120   :  { %v268_v5 = vadd.f32 %v1046_v43, %v267_v18  ;;  %v428_v19 = vadd.f32 %v396_v51, %v265_v26  ;;  %841 = vtanh.f32 %v452_v13 }
 0x121   :  { %v832_v25 = vpop.eup %831 }
 0x122   :  { %v511_v28 = vadd.f32 1.0, %v832_v25  ;;  %v834_v35 = vpop.eup %833  ;;  %v358_v25 = vmul.f32 %v326_v15, %v1200_v2  ;;  %v333_v30 = vmul.f32 0.044715, %v268_v5  ;;  %v301_v3 = vmul.f32 0.5, %v268_v5 }
 0x123   :  { %v598_v29 = vpop.f32.mrf.mxu1  ;;  %v512_v44 = vadd.f32 1.0, %v834_v35  ;;  %v836_v52 = vpop.eup %835  ;;  %v327_v35 = vmul.f32 0.044715, %v1215_v22 }
 0x124   :  { %v599_v33 = vadd.f32 %v1141_v9, %v598_v29  ;;  %v543_v34 = vmul.f32 %v511_v28, %v287_v27  ;;  %v513_v57 = vadd.f32 1.0, %v836_v52  ;;  %v838_v1 = vpop.eup %837  ;;  %v291_v27 = vmul.f32 0.5, %v1154_v21 }
 0x125   :  { %v544_v50 = vmul.f32 %v512_v44, %v288_v42  ;;  %v514_v7 = vadd.f32 1.0, %v838_v1  ;;  %v840_v17 = vpop.eup %839  ;;  %v460_v29 = vmul.f32 0.7978846, %v428_v19  ;;  %v365_v31 = vmul.f32 %v333_v30, %v268_v5 }
 0x126   :  { %692 = vst.msk [vmem:[%s1392_s5 + $0x8] sm:$0xff] %vm60_vm0, %v599_v33  ;;  %645 = vmatmul.f32.gmra.mxu2 %v543_v34  ;;  %v545_v0 = vmul.f32 %v513_v57, %v289_v56  ;;  %v515_v28 = vadd.f32 1.0, %v840_v17  ;;  %v453_v33 = vmul.f32 0.7978846, %v421_v24  ;;  %v390_v34 = vmul.f32 %v358_v25, %v1200_v2  ;;  %v842_v42 = vpop.eup %841 }
 0x127   :  { %v546_v36 = vmul.f32 %v514_v7, %v290_v6  ;;  %843 = vtanh.f32 %v460_v29  ;;  %v397_v41 = vmul.f32 %v365_v31, %v268_v5  ;;  %v1229_v44 = vadd.f32 %v1046_v43, %v1130_v38 }
 0x128   :  { %v547_v40 = vmul.f32 %v515_v28, %v291_v27  ;;  %845 = vtanh.f32 %v453_v33  ;;  %v359_v46 = vmul.f32 %v327_v35, %v1215_v22  ;;  %v300_v52 = vmul.f32 0.5, %v265_v26 }
 0x129   :  { %v429_v21 = vadd.f32 %v397_v41, %v268_v5  ;;  %v328_v38 = vmul.f32 0.044715, %v1229_v44  ;;  %v330_v19 = vmul.f32 0.044715, %v259_v39  ;;  %v295_v29 = vmul.f32 0.5, %v1215_v22 }
 0x12a   :  { %v391_v57 = vmul.f32 %v359_v46, %v1215_v22 }
 0x12b   :  { %v601_v45 = vpop.f32.mrf.mxu1  ;;  %v362_v28 = vmul.f32 %v330_v19, %v259_v39 }
 0x12c   :  { %v602_v49 = vadd.f32 %v1141_v9, %v601_v45  ;;  %v422_v45 = vadd.f32 %v390_v34, %v1200_v2  ;;  %v331_v34 = vmul.f32 0.044715, %v262_v63 }
 0x12d   :  { %v844_v47 = vpop.eup %843  ;;  %v394_v33 = vmul.f32 %v362_v28, %v259_v39 }
 0x12e   :  { %693 = vst.msk [vmem:[%s1392_s5 + $0x10] sm:$0xff] %vm60_vm0, %v602_v49  ;;  %648 = vmatmul.f32.gmra.mxu2 %v544_v50  ;;  %v516_v49 = vadd.f32 1.0, %v842_v42  ;;  %v461_v50 = vmul.f32 0.7978846, %v429_v21  ;;  %v524_v54 = vadd.f32 1.0, %v844_v47  ;;  %v846_v61 = vpop.eup %845  ;;  %v363_v11 = vmul.f32 %v331_v34, %v262_v63 }
 0x12f   :  { %v454_v56 = vmul.f32 0.7978846, %v422_v45  ;;  %v517_v26 = vadd.f32 1.0, %v846_v61  ;;  %v426_v43 = vadd.f32 %v394_v33, %v259_v39 }
 0x130   :  { %847 = vtanh.f32 %v461_v50  ;;  %v548_v60 = vmul.f32 %v516_v49, %v292_v48  ;;  %v395_v45 = vmul.f32 %v363_v11, %v262_v63  ;;  %v297_v50 = vmul.f32 0.5, %v1243_v37 }
 0x131   :  { %849 = vtanh.f32 %v454_v56  ;;  %v549_v13 = vmul.f32 %v517_v26, %v293_v23  ;;  %v458_v21 = vmul.f32 0.7978846, %v426_v43 }
 0x132   :  { %v427_v49 = vadd.f32 %v395_v45, %v262_v63 }
 0x133   :  { %v604_v58 = vpop.f32.mrf.mxu1 }
 0x134   :  { %v605_v62 = vadd.f32 %v1141_v9, %v604_v58  ;;  %v556_v58 = vmul.f32 %v524_v54, %v300_v52  ;;  %v459_v54 = vmul.f32 0.7978846, %v427_v49 }
 0x136   :  { %694 = vst.msk [vmem:[%s1392_s5 + $0x18] sm:$0xff] %vm60_vm0, %v605_v62  ;;  %651 = vmatmul.f32.gmra.mxu2 %v545_v0  ;;  %684 = vmatmul.f32.vlgmr.msrb.gmra.mxu3 %v556_v58  ;;  %v423_v62 = vadd.f32 %v391_v57, %v1215_v22  ;;  %v360_v0 = vmul.f32 %v328_v38, %v1229_v44  ;;  %v848_v1 = vpop.eup %847  ;;  %v296_v22 = vmul.f32 0.5, %v1229_v44  ;;  %v298_v58 = vmul.f32 0.5, %v259_v39 }
 0x137   :  { %v525_v4 = vadd.f32 1.0, %v848_v1  ;;  %v850_v14 = vpop.eup %849 }
 0x138   :  { %v455_v7 = vmul.f32 0.7978846, %v423_v62  ;;  %v392_v8 = vmul.f32 %v360_v0, %v1229_v44  ;;  %v518_v51 = vadd.f32 1.0, %v850_v14  ;;  %v299_v62 = vmul.f32 0.5, %v262_v63 }
 0x139   :  { %v557_v10 = vmul.f32 %v525_v4, %v301_v3 }
 0x13a   :  { %851 = vtanh.f32 %v455_v7  ;;  %v424_v15 = vadd.f32 %v392_v8, %v1229_v44 }
 0x13b   :  { %v607_v12 = vpop.f32.mrf.mxu1 }
 0x13c   :  { %v608_v16 = vadd.f32 %v1141_v9, %v607_v12  ;;  %v329_v12 = vmul.f32 0.044715, %v1243_v37  ;;  %v456_v18 = vmul.f32 0.7978846, %v424_v15 }
 0x13e   :  { %695 = vst.msk [vmem:[%s1392_s5 + $0x20] sm:$0xff] %vm60_vm0, %v608_v16  ;;  %654 = vmatmul.f32.gmra.mxu2 %v546_v36  ;;  %687 = vmatmul.f32.gmra.mxu3 %v557_v10  ;;  %v361_v16 = vmul.f32 %v329_v12, %v1243_v37  ;;  %v294_v36 = vmul.f32 0.5, %v1200_v2  ;;  %853 = vtanh.f32 %v456_v18 }
 0x140   :  { %v393_v5 = vmul.f32 %v361_v16, %v1243_v37  ;;  %v550_v25 = vmul.f32 %v518_v51, %v294_v36  ;;  %v852_v27 = vpop.eup %851 }
 0x141   :  { %v519_v30 = vadd.f32 1.0, %v852_v27 }
 0x142   :  { %v425_v2 = vadd.f32 %v393_v5, %v1243_v37 }
 0x143   :  { %v610_v32 = vpop.f32.mrf.mxu1 }
 0x144   :  { %v611_v53 = vadd.f32 %v1141_v9, %v610_v32  ;;  %v457_v32 = vmul.f32 0.7978846, %v425_v2 }
 0x146   :  { %696 = vst.msk [vmem:[%s1392_s5 + $0x28] sm:$0xff] %vm60_vm0, %v611_v53  ;;  %657 = vmatmul.f32.gmra.mxu2 %v547_v40  ;;  %v551_v53 = vmul.f32 %v519_v30, %v295_v29  ;;  %v854_v40 = vpop.eup %853  ;;  %855 = vtanh.f32 %v457_v32 }
 0x147   :  { %v520_v41 = vadd.f32 1.0, %v854_v40  ;;  %857 = vtanh.f32 %v458_v21 }
 0x148   :  { %859 = vtanh.f32 %v459_v54 }
 0x149   :  { %v552_v47 = vmul.f32 %v520_v41, %v296_v22 }
 0x14b   :  { %v613_v55 = vpop.f32.mrf.mxu1 }
 0x14c   :  { %v614_v59 = vadd.f32 %v1141_v9, %v613_v55  ;;  %v856_v48 = vpop.eup %855 }
 0x14d   :  { %v521_v52 = vadd.f32 1.0, %v856_v48  ;;  %v858_v57 = vpop.eup %857 }
 0x14e   :  { %697 = vst.msk [vmem:[%s1392_s5 + $0x30] sm:$0xff] %vm60_vm0, %v614_v59  ;;  %660 = vmatmul.f32.gmra.mxu2 %v548_v60  ;;  %v522_v38 = vadd.f32 1.0, %v858_v57  ;;  %v860_v37 = vpop.eup %859 }
 0x14f   :  { %v553_v56 = vmul.f32 %v521_v52, %v297_v50  ;;  %v523_v0 = vadd.f32 1.0, %v860_v37 }
 0x150   :  { %v554_v61 = vmul.f32 %v522_v38, %v298_v58 }
 0x151   :  { %v555_v26 = vmul.f32 %v523_v0, %v299_v62 }
 0x153   :  { %v616_v6 = vpop.f32.mrf.mxu1 }
 0x154   :  { %v617_v20 = vadd.f32 %v1141_v9, %v616_v6 }
 0x156   :  { %698 = vst.msk [vmem:[%s1392_s5 + $0x38] sm:$0xff] %vm60_vm0, %v617_v20  ;;  %663 = vmatmul.f32.gmra.mxu2 %v549_v13 }
 0x15b   :  { %v619_v17 = vpop.f32.mrf.mxu1 }
 0x15c   :  { %v620_v24 = vadd.f32 %v1141_v9, %v619_v17 }
 0x15e   :  { %699 = vst.msk [vmem:[%s1392_s5 + $0x40] sm:$0xff] %vm60_vm0, %v620_v24  ;;  %666 = vmatmul.f32.gmra.mxu2 %v550_v25 }
 0x163   :  { %v622_v31 = vpop.f32.mrf.mxu1 }
 0x164   :  { %v623_v35 = vadd.f32 %v1141_v9, %v622_v31 }
 0x166   :  { %700 = vst.msk [vmem:[%s1392_s5 + $0x48] sm:$0xff] %vm60_vm0, %v623_v35  ;;  %669 = vmatmul.f32.gmra.mxu2 %v551_v53 }
 0x16b   :  { %v625_v42 = vpop.f32.mrf.mxu1 }
 0x16c   :  { %v626_v46 = vadd.f32 %v1141_v9, %v625_v42 }
 0x16e   :  { %701 = vst.msk [vmem:[%s1392_s5 + $0x50] sm:$0xff] %vm60_vm0, %v626_v46  ;;  %672 = vmatmul.f32.gmra.mxu2 %v552_v47 }
 0x173   :  { %v628_v44 = vpop.f32.mrf.mxu1 }
 0x174   :  { %v629_v55 = vadd.f32 %v1141_v9, %v628_v44 }
 0x176   :  { %702 = vst.msk [vmem:[%s1392_s5 + $0x58] sm:$0xff] %vm60_vm0, %v629_v55  ;;  %675 = vmatmul.f32.gmra.mxu2 %v553_v56 }
 0x17b   :  { %v631_v59 = vpop.f32.mrf.mxu1 }
 0x17c   :  { %v632_v60 = vadd.f32 %v1141_v9, %v631_v59 }
 0x17e   :  { %703 = vst.msk [vmem:[%s1392_s5 + $0x60] sm:$0xff] %vm60_vm0, %v632_v60  ;;  %678 = vmatmul.f32.gmra.mxu2 %v554_v61 }
 0x183   :  { %v634_v1 = vpop.f32.mrf.mxu1 }
 0x184   :  { %v635_v23 = vadd.f32 %v1141_v9, %v634_v1 }
 0x186   :  { %704 = vst.msk [vmem:[%s1392_s5 + $0x68] sm:$0xff] %vm60_vm0, %v635_v23  ;;  %681 = vmatmul.f32.gmra.mxu2 %v555_v26 }
 0x18b   :  { %v637_v3 = vpop.f32.mrf.mxu1 }
 0x18c   :  { %v638_v4 = vadd.f32 %v1141_v9, %v637_v3 }
 0x18e   :  { %705 = vst.msk [vmem:[%s1392_s5 + $0x70] sm:$0xff] %vm60_vm0, %v638_v4 }
 0x199   :  { %v640_v6 = vpop.f32.mrf.mxu2 }
 0x19a   :  { %v641_v7 = vadd.f32 %v1141_v9, %v640_v6 }
 0x19c   :  { %706 = vst.msk [vmem:[%s1392_s5 + $0x78] sm:$0xff] %vm60_vm0, %v641_v7 }
 0x1a1   :  { %v643_v8 = vpop.f32.mrf.mxu2 }
 0x1a2   :  { %v644_v10 = vadd.f32 %v1141_v9, %v643_v8 }
 0x1a4   :  { %707 = vst.msk [vmem:[%s1392_s5 + $0x80] sm:$0xff] %vm60_vm0, %v644_v10 }
 0x1a9   :  { %v646_v12 = vpop.f32.mrf.mxu2 }
 0x1aa   :  { %v647_v20 = vadd.f32 %v1141_v9, %v646_v12 }
 0x1ac   :  { %708 = vst.msk [vmem:[%s1392_s5 + $0x88] sm:$0xff] %vm60_vm0, %v647_v20 }
 0x1b1   :  { %v649_v13 = vpop.f32.mrf.mxu2 }
 0x1b2   :  { %v650_v14 = vadd.f32 %v1141_v9, %v649_v13 }
 0x1b4   :  { %709 = vst.msk [vmem:[%s1392_s5 + $0x90] sm:$0xff] %vm60_vm0, %v650_v14 }
 0x1b9   :  { %v652_v39 = vpop.f32.mrf.mxu2  ;;  %v685_v18 = vpop.f32.mrf.mxu3 }
 0x1ba   :  { %v653_v15 = vadd.f32 %v1141_v9, %v652_v39  ;;  %v686_v19 = vadd.f32 %v1141_v9, %v685_v18 }
 0x1bc   :  { %710 = vst.msk [vmem:[%s1392_s5 + $0x98] sm:$0xff] %vm60_vm0, %v653_v15 }
 0x1bd   :  { %721 = vst.msk [vmem:[%s1392_s5 + $0xf0] sm:$0xff] %vm60_vm0, %v686_v19 }
 0x1c1   :  { %v655_v16 = vpop.f32.mrf.mxu2  ;;  %v688_v25 = vpop.f32.mrf.mxu3 }
 0x1c2   :  { %v656_v36 = vadd.f32 %v1141_v9, %v655_v16  ;;  %v689_v63 = vadd.f32 %v1141_v9, %v688_v25 }
 0x1c4   :  { %711 = vst.msk [vmem:[%s1392_s5 + $0xa0] sm:$0xff] %vm60_vm0, %v656_v36 }
 0x1c5   :  { %722 = vst.msk [vmem:[%s1392_s5 + $0xf8] sm:$0xff] %vm60_vm0, %v689_v63 }
 0x1c9   :  { %v658_v51 = vpop.f32.mrf.mxu2 }
 0x1ca   :  { %v659_v17 = vadd.f32 %v1141_v9, %v658_v51 }
 0x1cc   :  { %712 = vst.msk [vmem:[%s1392_s5 + $0xa8] sm:$0xff] %vm60_vm0, %v659_v17 }
 0x1d1   :  { %v661_v5 = vpop.f32.mrf.mxu2 }
 0x1d2   :  { %v662_v24 = vadd.f32 %v1141_v9, %v661_v5 }
 0x1d4   :  { %713 = vst.msk [vmem:[%s1392_s5 + $0xb0] sm:$0xff] %vm60_vm0, %v662_v24 }
 0x1d9   :  { %v664_v27 = vpop.f32.mrf.mxu2 }
 0x1da   :  { %v665_v2 = vadd.f32 %v1141_v9, %v664_v27 }
 0x1dc   :  { %714 = vst.msk [vmem:[%s1392_s5 + $0xb8] sm:$0xff] %vm60_vm0, %v665_v2 }
 0x1e1   :  { %v667_v28 = vpop.f32.mrf.mxu2 }
 0x1e2   :  { %v668_v29 = vadd.f32 %v1141_v9, %v667_v28 }
 0x1e4   :  { %715 = vst.msk [vmem:[%s1392_s5 + $0xc0] sm:$0xff] %vm60_vm0, %v668_v29 }
 0x1e9   :  { %v670_v30 = vpop.f32.mrf.mxu2 }
 0x1ea   :  { %v671_v31 = vadd.f32 %v1141_v9, %v670_v30 }
 0x1ec   :  { %716 = vst.msk [vmem:[%s1392_s5 + $0xc8] sm:$0xff] %vm60_vm0, %v671_v31 }
 0x1f1   :  { %v673_v32 = vpop.f32.mrf.mxu2 }
 0x1f2   :  { %v674_v33 = vadd.f32 %v1141_v9, %v673_v32 }
 0x1f4   :  { %717 = vst.msk [vmem:[%s1392_s5 + $0xd0] sm:$0xff] %vm60_vm0, %v674_v33 }
 0x1f9   :  { %v676_v34 = vpop.f32.mrf.mxu2 }
 0x1fa   :  { %v677_v35 = vadd.f32 %v1141_v9, %v676_v34 }
 0x1fc   :  { %718 = vst.msk [vmem:[%s1392_s5 + $0xd8] sm:$0xff] %vm60_vm0, %v677_v35 }
 0x201   :  { %v679_v53 = vpop.f32.mrf.mxu2 }
 0x202   :  { %v680_v40 = vadd.f32 %v1141_v9, %v679_v53 }
 0x204   :  { %719 = vst.msk [vmem:[%s1392_s5 + $0xe0] sm:$0xff] %vm60_vm0, %v680_v40 }
 0x209   :  { %v682_v43 = vpop.f32.mrf.mxu2 }
 0x20a   :  { %v683_v11 = vadd.f32 %v1141_v9, %v682_v43 }
 0x20c   :  { %720 = vst.msk [vmem:[%s1392_s5 + $0xe8] sm:$0xff] %vm60_vm0, %v683_v11 }

</bundles_post_ra>
